<compile_context>
chip_gen: v5e
topology: v5e:2x2
jax: 0.10.0
libtpu: 0.0.40
codegen_flags: <defaults>
</compile_context>

<pallas_src>
import jax
import jax.numpy as jnp
from jax.experimental import pallas as pl
from jax.experimental.pallas import tpu as pltpu


def _round_up(x, m):
    return (x + m - 1) // m * m


def _patch_proj_kernel(x_ref, w_ref, b_ref, o_ref):
    # x_ref: (TM, Kp) bf16 patch rows        (TM = M tile, Kp = padded C*P*P)
    # w_ref: (Kp, Np) bf16 flattened conv weight (Np = padded embed_dim)
    # b_ref: (1,  Np) f32 bias
    # o_ref: (TM, Np) output tile
    acc = jnp.dot(x_ref[...], w_ref[...], preferred_element_type=jnp.float32)
    o_ref[...] = (acc + b_ref[...]).astype(o_ref.dtype)


def patch_embedding(x, weight, bias, patch_size, *, tm=512):
    """x: [B, C, H, W]; weight: [E, C, P, P]; bias: [E] -> [B, num_patches, E]."""
    B, C, H, W = x.shape
    E = weight.shape[0]
    P = patch_size
    hp, wp = H // P, W // P
    num_patches = hp * wp
    out_dtype = x.dtype

    # bf16 MXU inputs; cast before the big activation transpose to halve its
    # HBM traffic. Accumulation stays fp32 inside the kernel.
    x_bf = x.astype(jnp.bfloat16)
    w_bf = weight.astype(jnp.bfloat16)

    # --- XLA glue: non-overlapping patch extraction, channel-major flatten ---
    # (B, C, hp, P, wp, P) -> (B, hp, wp, C, P, P) -> (B*num_patches, C*P*P)
    patches = x_bf.reshape(B, C, hp, P, wp, P)
    patches = patches.transpose(0, 2, 4, 1, 3, 5)
    patches = patches.reshape(B * num_patches, C * P * P)

    # Conv weight [E, C, P, P] -> [C*P*P, E] so that patches @ w == conv out.
    w_mat = w_bf.reshape(E, C * P * P).T
    b_mat = bias.astype(jnp.float32).reshape(1, E)

    M, K = patches.shape
    N = E

    # --- pad for lane density (128) and clean M tiling -----------------------
    Kp = _round_up(K, 128)
    Np = _round_up(N, 128)
    TM = min(tm, _round_up(M, 8))          # TM is a multiple of 8
    Mp = _round_up(M, TM)

    if Mp != M or Kp != K:
        patches = jnp.pad(patches, ((0, Mp - M), (0, Kp - K)))
    if Kp != K or Np != N:
        w_mat = jnp.pad(w_mat, ((0, Kp - K), (0, Np - N)))
    if Np != N:
        b_mat = jnp.pad(b_mat, ((0, 0), (0, Np - N)))

    grid_m = Mp // TM

    itemsize_in = jnp.dtype(jnp.bfloat16).itemsize
    cost = pl.CostEstimate(
        flops=2 * Mp * Kp * Np,
        transcendentals=0,
        bytes_accessed=(Mp * Kp * itemsize_in
                        + Kp * Np * itemsize_in
                        + Mp * Np * jnp.dtype(out_dtype).itemsize),
    )

    out = pl.pallas_call(
        _patch_proj_kernel,
        out_shape=jax.ShapeDtypeStruct((Mp, Np), out_dtype),
        grid_spec=pltpu.PrefetchScalarGridSpec(
            num_scalar_prefetch=0,
            grid=(grid_m,),
            in_specs=[
                pl.BlockSpec((TM, Kp), lambda i: (i, 0)),   # patches tile
                pl.BlockSpec((Kp, Np), lambda i: (0, 0)),   # weight (resident)
                pl.BlockSpec((1, Np), lambda i: (0, 0)),    # bias   (resident)
            ],
            out_specs=pl.BlockSpec((TM, Np), lambda i: (i, 0)),
        ),
        compiler_params=pltpu.CompilerParams(
            dimension_semantics=("parallel",),
            vmem_limit_bytes=48 * 1024 * 1024,
        ),
        cost_estimate=cost,
    )(patches, w_mat, b_mat)

    # drop padding, reshape to (B, num_patches, E) == flatten(2).transpose(1,2)
    out = out[:M, :N]
    return out.reshape(B, num_patches, E)


if __name__ == "__main__":
    # Small shapes consistent with the module:
    # img_size=16, patch_size=4, in_channels=4, embed_dim=32 -> num_patches=16
    B, C, H, W = 2, 4, 16, 16
    P = 4
    E = 32

    key = jax.random.PRNGKey(0)
    kx, kw, kb = jax.random.split(key, 3)

    x = jax.random.normal(kx, (B, C, H, W), dtype=jnp.float32)
    # Deterministic synthetic parameters (shapes from nn.Conv2d(C, E, P, P)).
    weight = jax.random.normal(kw, (E, C, P, P), dtype=jnp.float32) * 0.02
    bias = jax.random.normal(kb, (E,), dtype=jnp.float32) * 0.02

    out = jax.block_until_ready(patch_embedding(x, weight, bias, P))
    assert out.shape == (B, (H // P) * (W // P), E), out.shape

    # Reference check against lax conv (same semantics as nn.Conv2d).
    # The kernel feeds bf16 into the MXU (fp32 accumulate), so compare against
    # a reference computed from the same bf16-rounded inputs.
    x32 = x.astype(jnp.bfloat16).astype(jnp.float32)
    w32 = weight.astype(jnp.bfloat16).astype(jnp.float32)
    ref = jax.lax.conv_general_dilated(
        x32, w32, window_strides=(P, P), padding="VALID",
        dimension_numbers=("NCHW", "OIHW", "NCHW"))
    ref = ref + bias[None, :, None, None]
    ref = ref.reshape(B, E, -1).transpose(0, 2, 1)
    assert jnp.allclose(out, ref, atol=2e-3, rtol=2e-3), (
        jnp.max(jnp.abs(out - ref)))

    print("KERNEL_OK")
</pallas_src>

<mosaic_0001>
module attributes {stable_mosaic.version = 11 : i64} {
  func.func @_patch_proj_kernel(%arg0: i32, %arg1: memref<32x128xbf16, #tpu.memory_space<vmem>>, %arg2: memref<128x128xbf16, #tpu.memory_space<vmem>>, %arg3: memref<1x128xf32, #tpu.memory_space<vmem>>, %arg4: memref<32x128xf32, #tpu.memory_space<vmem>>) attributes {dimension_semantics = [#tpu.dimension_semantics<parallel>], iteration_bounds = array<i64: 1>, scalar_prefetch = 0 : i64, scratch_operands = 0 : i64, tpu.core_type = #tpu.core_type<tc>, window_params = [{transform_indices = @transform_0, window_bounds = array<i64: 32, 128>}, {pipeline_mode = #tpu.pipeline_mode<synchronous>, transform_indices = @transform_1, window_bounds = array<i64: 128, 128>}, {pipeline_mode = #tpu.pipeline_mode<synchronous>, transform_indices = @transform_2, window_bounds = array<i64: 1, 128>}, {transform_indices = @transform_3, window_bounds = array<i64: 32, 128>}]} {
    %c0 = arith.constant 0 : index
    %c0_0 = arith.constant 0 : index
    %0 = vector.load %arg1[%c0, %c0_0] : memref<32x128xbf16, #tpu.memory_space<vmem>>, vector<32x128xbf16>
    %c0_1 = arith.constant 0 : index
    %c0_2 = arith.constant 0 : index
    %1 = vector.load %arg2[%c0_1, %c0_2] : memref<128x128xbf16, #tpu.memory_space<vmem>>, vector<128x128xbf16>
    %cst = arith.constant dense<0.000000e+00> : vector<32x128xf32>
    %2 = tpu.matmul %0, %1, %cst {dimension_numbers = #tpu.dot_dimension_numbers<[1], [0], [0], [1], [0, 0, 1, 1], [], []>} : vector<32x128xbf16>, vector<128x128xbf16>, vector<32x128xf32> -> vector<32x128xf32>
    %c0_3 = arith.constant 0 : index
    %c0_4 = arith.constant 0 : index
    %3 = vector.load %arg3[%c0_3, %c0_4] : memref<1x128xf32, #tpu.memory_space<vmem>>, vector<1x128xf32>
    %4 = vector.broadcast %3 : vector<1x128xf32> to vector<32x128xf32>
    %5 = arith.addf %2, %4 : vector<32x128xf32>
    %c0_5 = arith.constant 0 : index
    %c0_6 = arith.constant 0 : index
    %6 = vector.load %arg4[%c0_5, %c0_6] : memref<32x128xf32, #tpu.memory_space<vmem>>, vector<32x128xf32>
    tpu.vector_store %arg4[%c0_5, %c0_6], %5 {strides = array<i32>} : memref<32x128xf32, #tpu.memory_space<vmem>>, vector<32x128xf32>,
    return
  }
  func.func @transform_0(%arg0: i32) -> (i32, i32) {
    %c0_i32 = arith.constant 0 : i32
    %c0_i32_0 = arith.constant 0 : i32
    return %arg0, %c0_i32 : i32, i32
  }
  func.func @transform_1(%arg0: i32) -> (i32, i32) {
    %c0_i32 = arith.constant 0 : i32
    %c0_i32_0 = arith.constant 0 : i32
    %c0_i32_1 = arith.constant 0 : i32
    return %c0_i32, %c0_i32_0 : i32, i32
  }
  func.func @transform_2(%arg0: i32) -> (i32, i32) {
    %c0_i32 = arith.constant 0 : i32
    %c0_i32_0 = arith.constant 0 : i32
    %c0_i32_1 = arith.constant 0 : i32
    return %c0_i32, %c0_i32_0 : i32, i32
  }
  func.func @transform_3(%arg0: i32) -> (i32, i32) {
    %c0_i32 = arith.constant 0 : i32
    %c0_i32_0 = arith.constant 0 : i32
    return %arg0, %c0_i32 : i32, i32
  }
}

</mosaic_0001>

<bundles_post_ra>
// kernel: tpu_custom_call.1
= control target key start
LH: loop header
LB: loop body
LE: loop exit
PB: predicated region body
PF: predicated region fallthrough
CT: control target
= control target key end

     0   :  { %8 = vsyncpa [#allocation3], 0  ;;  %s357_s0 = inlined_call_operand.hbm [shape: bf16[32,128], index: 0, kind: input, shape index: {}]   ;;  %s358_s1 = inlined_call_operand.hbm [shape: bf16[128,128], index: 1, kind: input, shape index: {}]   ;;  %s359_s2 = inlined_call_operand.vmem [shape: f32[1,128], index: 2, kind: input, shape index: {}]   ;;  %s360_s3 = inlined_call_operand.hbm [shape: f32[32,128], index: 3, kind: output, shape index: {}]  }
   0x1   :  { %9 = vsyncpa [#allocation6], 0 }
   0x2   :  { %10 = vsyncpa [#allocation4], 0  ;;  %s15_s14 = sshll.u32 %s357_s0, 4  ;;  %s318_s15 = smov [#allocation2]   ;;  %s16_s14 = int_to_ptr.hbm [resolvable:$true] %s15_s14 }
   0x3   :  { %s17_s16 = sshll.u32 %s318_s15, 4  ;;  %s28_s19 = sshll.u32 %s358_s1, 4  ;;  %s18_s16 = int_to_ptr.vmem [resolvable:$true] %s17_s16  ;;  %s29_s19 = int_to_ptr.hbm [resolvable:$true] %s28_s19 }
   0x4   :  { %s319_s20 = smov 64   ;;  %s320_s21 = smov 4  }
   0x5   :  { %23 = dma.hbm_to_vmem [thread:$0]  %s16_s14, 256, %s18_s16, [#allocation3], %s319_s20, %s319_s20, %s320_s21  }
   0x6   :  { %s321_s22 = smov [#allocation5]  }
   0x7   :  { %s30_s23 = sshll.u32 %s321_s22, 4  ;;  %s31_s23 = int_to_ptr.vmem [resolvable:$true] %s30_s23 }
   0x8   :  { %36 = dma.hbm_to_vmem [thread:$0]  %s29_s19, 1024, %s31_s23, [#allocation6], %s319_s20, %s319_s20, %s320_s21  }
   0x9   :  { %312 = dma.done.wait [#allocation3], 256  }
   0xa   :  { %313 = vsyncadd [#allocation3], 4294967040 }
   0xb   :  { %314 = dma.done.wait [#allocation6], 1024  }
   0xc   :  { %315 = vsyncadd [#allocation6], 4294966272  ;;  %v223_v0 = vld [vmem:[#allocation5 + $0x38] sm:$0xff]  ;;  %v222_v1 = vld [vmem:[#allocation5 + $0x30] sm:$0xff]  ;;  %s322_s24 = smov [#allocation7]   ;;  %s160_s28 = sshll.u32 %s360_s3, 4  ;;  %s161_s28 = int_to_ptr.hbm [resolvable:$true] %s160_s28 }
   0xd   :  { %131 = vmatpush.bf16.msra.mxu0 %v223_v0  ;;  %224 = vmatpush.bf16.msra.mxu1 %v223_v0  ;;  %v221_v2 = vld [vmem:[#allocation5 + $0x28] sm:$0xff]  ;;  %v220_v3 = vld [vmem:[#allocation5 + $0x20] sm:$0xff]  ;;  %v219_v4 = vld [vmem:[#allocation5 + $0x18] sm:$0xff]  ;;  %s158_s25 = sshll.u32 %s322_s24, 4  ;;  %s324_s29 = smov 8   ;;  %s159_s25 = int_to_ptr.vmem [resolvable:$true] %s158_s25 }
   0xe   :  { %v218_v5 = vld [vmem:[#allocation5 + $0x10] sm:$0xff]  ;;  %v217_v6 = vld [vmem:[#allocation5 + $0x8] sm:$0xff]  ;;  %v216_v7 = vld [vmem:[#allocation5] sm:$0xff] }
   0xf   :  { %v214_v8 = vld [vmem:[#allocation2] sm:$0xff]  ;;  %v215_v9 = vld [vmem:[#allocation2 + $0x8] sm:$0xff] }
  0x10   :  { %v239_v10 = vld [vmem:[%s359_s2] ss:$0 sm:$0xff]  ;;  %s323_s2 = smov 128  }
  0x11   :  { %132 = vmatpush.bf16.msra.mxu0 %v222_v1  ;;  %225 = vmatpush.bf16.msra.mxu1 %v222_v1 }
  0x15   :  { %133 = vmatpush.bf16.msra.mxu0 %v221_v2  ;;  %226 = vmatpush.bf16.msra.mxu1 %v221_v2 }
  0x19   :  { %134 = vmatpush.bf16.msra.mxu0 %v220_v3  ;;  %227 = vmatpush.bf16.msra.mxu1 %v220_v3 }
  0x1d   :  { %135 = vmatpush.bf16.msra.mxu0 %v219_v4  ;;  %228 = vmatpush.bf16.msra.mxu1 %v219_v4 }
  0x21   :  { %136 = vmatpush.bf16.msra.mxu0 %v218_v5  ;;  %229 = vmatpush.bf16.msra.mxu1 %v218_v5 }
  0x25   :  { %137 = vmatpush.bf16.msra.mxu0 %v217_v6  ;;  %230 = vmatpush.bf16.msra.mxu1 %v217_v6 }
  0x29   :  { %138 = vmatpush.bf16.msra.mxu0 %v216_v7  ;;  %231 = vmatpush.bf16.msra.mxu1 %v216_v7 }
  0x2c   :  { %139 = vmatmul.bf16.vlgmr.msra.gmra.mxu0 %v214_v8  ;;  %144 = vmatmul.bf16.vlgmr.msra.gmra.mxu1 %v215_v9 }
  0xa9   :  { %v140_v11 = vpop.f32.mrf.mxu0  ;;  %v145_v12 = vpop.f32.mrf.mxu1 }
  0xaa   :  { %v141_v13 = vadd.f32 %v239_v10, %v140_v11  ;;  %v146_v14 = vadd.f32 %v239_v10, %v145_v12 }
  0xac   :  { %150 = vst [vmem:[#allocation7] sm:$0xff] %v141_v13 }
  0xad   :  { %152 = vst [vmem:[#allocation7 + $0x10] sm:$0xff] %v146_v14 }
  0xb1   :  { %v142_v15 = vpop.f32.mrf.mxu0  ;;  %v147_v16 = vpop.f32.mrf.mxu1 }
  0xb2   :  { %v143_v17 = vadd.f32 %v239_v10, %v142_v15  ;;  %v148_v18 = vadd.f32 %v239_v10, %v147_v16 }
  0xb4   :  { %151 = vst [vmem:[#allocation7 + $0x8] sm:$0xff] %v143_v17 }
  0xb5   :  { %153 = vst [vmem:[#allocation7 + $0x18] sm:$0xff] %v148_v18 }
  0xb6   :  { %166 = dma.vmem_to_hbm [thread:$0]  %s159_s25, 512, %s161_s28, [#allocation4], %s323_s2, %s323_s2, %s324_s29  }
  0xb7   :  { %316 = dma.done.wait [#allocation4], 512  }
  0xb8   :  { %317 = vsyncadd [#allocation4], 4294966784 }
  0xb9   :  { %171 = vsyncpa [#allocation3], 1 }
  0xba   :  { %172 = vsyncpa [#allocation6], 1 }
  0xbb   :  { %173 = vsyncpa [#allocation4], 1 }

</bundles_post_ra>
